<compile_context>
chip_gen: v7x
topology: tpu7x:2x2x1
jax: 0.10.0
libtpu: 0.0.40
codegen_flags: <defaults>
</compile_context>

<pallas_src>
import jax
import jax.numpy as jnp
from jax.experimental import pallas as pl
from jax.experimental.pallas import tpu as pltpu

LANES = 128
MAX_BLOCK_ROWS = 4096      # (4096, 128) f32 = 2 MiB per input block
NUM_SLICES_MAX = 2         # leading "parallel" grid axis for v7x megacore


def _make_kernel(row_tile, lanes, blocks_per_slice, n_valid, needs_mask, gamma):
    block_elems = row_tile * lanes

    def kernel(x_ref, t_ref, out_ref):
        c = pl.program_id(0)           # parallel slice (TensorCore on v7x)
        i = pl.program_id(1)           # reduction step within the slice

        @pl.when(i == 0)
        def _():
            out_ref[...] = jnp.zeros_like(out_ref)

        x = x_ref[...].astype(jnp.float32)
        t = t_ref[...].astype(jnp.float32)

        if needs_mask:
            # Global flat index of every element in this block, to exclude the
            # lane-padding zeros and any out-of-range partial last block.
            block_start = (c * blocks_per_slice + i) * block_elems
            row_ids = jax.lax.broadcasted_iota(jnp.int32, (row_tile, lanes), 0)
            col_ids = jax.lax.broadcasted_iota(jnp.int32, (row_tile, lanes), 1)
            flat_idx = block_start + row_ids * lanes + col_ids
            valid = flat_idx < n_valid
            # Sanitize before transcendentals (OOB block contents are unspecified).
            x = jnp.where(valid, x, 0.0)
            t = jnp.where(valid, t, 0.0)

        # Stable BCE-with-logits (general form, supports soft targets):
        #   x - x*t + max(-x, 0) + log(1 + exp(-|x|))
        e_x = jnp.exp(-jnp.abs(x))
        bce = x - x * t + jnp.maximum(-x, 0.0) + jnp.log(1.0 + e_x)

        # Modulating factor exp(gamma * logsigmoid(z)), z = -x*(2t-1).
        z = -x * (t * 2.0 - 1.0)
        e_z = jnp.exp(-jnp.abs(z))
        if gamma == 2.0:
            # sigmoid(z)**2 via the stable exp(-|z|) form: 2 EUP ops + 1 divide.
            p = jnp.where(z >= 0.0, 1.0, e_z) / (1.0 + e_z)
            factor = p * p
        else:
            log_sig = -(jnp.maximum(-z, 0.0) + jnp.log(1.0 + e_z))
            factor = jnp.exp(gamma * log_sig)

        loss = factor * bce
        if needs_mask:
            loss = jnp.where(valid, loss, 0.0)

        # Per-lane partial sums accumulate into the resident output block;
        # the single cross-lane reduce happens in the wrapper (tiny).
        out_ref[...] += jnp.sum(loss, axis=0, keepdims=True)

    return kernel


def focal_loss(logit, target, gamma=2.0, reduction="mean"):
    n = logit.size

    flat_logit = logit.reshape(-1)
    flat_target = target.reshape(-1)

    # Pad only when the element count is not lane-aligned.
    rem = n % LANES
    if rem:
        pad = LANES - rem
        flat_logit = jnp.pad(flat_logit, (0, pad))
        flat_target = jnp.pad(flat_target, (0, pad))
    rows = flat_logit.size // LANES

    logit2d = flat_logit.reshape(rows, LANES)
    target2d = flat_target.reshape(rows, LANES)

    row_tile = min(MAX_BLOCK_ROWS, rows)
    blocks_total = pl.cdiv(rows, row_tile)
    # Split across both TensorCores (v7x) only when the split is exact.
    num_slices = NUM_SLICES_MAX if blocks_total % NUM_SLICES_MAX == 0 else 1
    bps = blocks_total // num_slices

    # Masking code is only emitted when the padded slab has extra elements
    # (lane padding and/or a partial trailing block).
    needs_mask = (blocks_total * row_tile * LANES) != n

    kernel = _make_kernel(row_tile, LANES, bps, n, needs_mask, float(gamma))
    in_spec = pl.BlockSpec((row_tile, LANES), lambda c, i: (c * bps + i, 0))

    partials = pl.pallas_call(
        kernel,
        out_shape=jax.ShapeDtypeStruct((1, num_slices * LANES), jnp.float32),
        grid_spec=pltpu.PrefetchScalarGridSpec(
            num_scalar_prefetch=0,
            grid=(num_slices, bps),
            in_specs=[in_spec, in_spec],
            out_specs=pl.BlockSpec((1, LANES), lambda c, i: (0, c)),
        ),
        compiler_params=pltpu.CompilerParams(
            dimension_semantics=("parallel", "arbitrary"),
        ),
    )(logit2d, target2d)

    total = jnp.sum(partials)
    if reduction == "mean":
        return total / jnp.float32(n)
    elif reduction == "sum":
        return total
    else:
        raise ValueError(f"unsupported reduction: {reduction}")


def _focal_loss_ref(logit, target, gamma=2.0):
    logit = logit.astype(jnp.float32)
    target = target.astype(jnp.float32)
    max_val = jnp.maximum(-logit, 0.0)
    loss = (logit - logit * target + max_val
            + jnp.log(jnp.exp(-max_val) + jnp.exp(-logit - max_val)))
    invprobs = jax.nn.log_sigmoid(-logit * (target * 2.0 - 1.0))
    loss = jnp.exp(invprobs * gamma) * loss
    return loss.mean()


if __name__ == "__main__":
    key = jax.random.PRNGKey(0)
    k1, k2 = jax.random.split(key)

    # NCHW inputs, consistent with the module's elementwise forward.
    logit = jax.random.normal(k1, (2, 4, 16, 16), dtype=jnp.float32)
    target = (jax.random.uniform(k2, (2, 4, 16, 16)) > 0.5).astype(jnp.float32)

    out = jax.block_until_ready(focal_loss(logit, target, gamma=2.0, reduction="mean"))
    ref = _focal_loss_ref(logit, target, gamma=2.0)
    assert jnp.allclose(out, ref, rtol=1e-5, atol=1e-5), (out, ref)

    # Second check: lane-unaligned element count exercises the in-kernel tail mask.
    k3, k4 = jax.random.split(k2)
    logit_u = jax.random.normal(k3, (2, 3, 7, 5), dtype=jnp.float32)
    target_u = (jax.random.uniform(k4, (2, 3, 7, 5)) > 0.5).astype(jnp.float32)
    out_u = jax.block_until_ready(focal_loss(logit_u, target_u))
    ref_u = _focal_loss_ref(logit_u, target_u)
    assert jnp.allclose(out_u, ref_u, rtol=1e-5, atol=1e-5), (out_u, ref_u)

    print("KERNEL_OK")
</pallas_src>

<mosaic_0001>
module attributes {stable_mosaic.version = 11 : i64} {
  func.func @kernel(%arg0: i32, %arg1: i32, %arg2: memref<16x128xf32, #tpu.memory_space<vmem>>, %arg3: memref<16x128xf32, #tpu.memory_space<vmem>>, %arg4: memref<1x128xf32, #tpu.memory_space<vmem>>) attributes {dimension_semantics = [#tpu.dimension_semantics<parallel>, #tpu.dimension_semantics<arbitrary>], iteration_bounds = array<i64: 1, 1>, scalar_prefetch = 0 : i64, scratch_operands = 0 : i64, tpu.core_type = #tpu.core_type<tc>, window_params = [{transform_indices = @transform_0, window_bounds = array<i64: 16, 128>}, {transform_indices = @transform_1, window_bounds = array<i64: 16, 128>}, {transform_indices = @transform_2, window_bounds = array<i64: 1, 128>}]} {
    %c0_i32 = arith.constant 0 : i32
    %0 = arith.cmpi eq, %arg1, %c0_i32 : i32
    %1 = arith.extui %0 : i1 to i32
    %c0_i32_0 = arith.constant 0 : i32
    %2 = arith.cmpi ne, %1, %c0_i32_0 : i32
    scf.if %2 {
      %cst_19 = arith.constant 0.000000e+00 : f32
      %45 = vector.broadcast %cst_19 : f32 to vector<1x128xf32>
      %c0_20 = arith.constant 0 : index
      %c0_21 = arith.constant 0 : index
      %46 = vector.load %arg4[%c0_20, %c0_21] : memref<1x128xf32, #tpu.memory_space<vmem>>, vector<1x128xf32>
      tpu.vector_store %arg4[%c0_20, %c0_21], %45 {strides = array<i32>} : memref<1x128xf32, #tpu.memory_space<vmem>>, vector<1x128xf32>,
    } else {
    }
    %c0 = arith.constant 0 : index
    %c0_1 = arith.constant 0 : index
    %3 = vector.load %arg2[%c0, %c0_1] : memref<16x128xf32, #tpu.memory_space<vmem>>, vector<16x128xf32>
    %c0_2 = arith.constant 0 : index
    %c0_3 = arith.constant 0 : index
    %4 = vector.load %arg3[%c0_2, %c0_3] : memref<16x128xf32, #tpu.memory_space<vmem>>, vector<16x128xf32>
    %5 = math.absf %3 : vector<16x128xf32>
    %cst = arith.constant 0.000000e+00 : f32
    %6 = vector.broadcast %cst : f32 to vector<16x128xf32>
    %7 = arith.subf %6, %5 : vector<16x128xf32>
    %8 = math.exp %7 : vector<16x128xf32>
    %9 = arith.mulf %3, %4 : vector<16x128xf32>
    %10 = arith.subf %3, %9 : vector<16x128xf32>
    %cst_4 = arith.constant 0.000000e+00 : f32
    %11 = vector.broadcast %cst_4 : f32 to vector<16x128xf32>
    %12 = arith.subf %11, %3 : vector<16x128xf32>
    %cst_5 = arith.constant 0.000000e+00 : f32
    %13 = vector.broadcast %cst_5 : f32 to vector<16x128xf32>
    %14 = arith.maximumf %12, %13 : vector<16x128xf32>
    %15 = arith.addf %10, %14 : vector<16x128xf32>
    %cst_6 = arith.constant 1.000000e+00 : f32
    %16 = vector.broadcast %cst_6 : f32 to vector<16x128xf32>
    %17 = arith.addf %16, %8 : vector<16x128xf32>
    %18 = math.log %17 : vector<16x128xf32>
    %19 = arith.addf %15, %18 : vector<16x128xf32>
    %cst_7 = arith.constant 0.000000e+00 : f32
    %20 = vector.broadcast %cst_7 : f32 to vector<16x128xf32>
    %21 = arith.subf %20, %3 : vector<16x128xf32>
    %cst_8 = arith.constant 2.000000e+00 : f32
    %22 = vector.broadcast %cst_8 : f32 to vector<16x128xf32>
    %23 = arith.mulf %4, %22 : vector<16x128xf32>
    %cst_9 = arith.constant 1.000000e+00 : f32
    %24 = vector.broadcast %cst_9 : f32 to vector<16x128xf32>
    %25 = arith.subf %23, %24 : vector<16x128xf32>
    %26 = arith.mulf %21, %25 : vector<16x128xf32>
    %27 = math.absf %26 : vector<16x128xf32>
    %cst_10 = arith.constant 0.000000e+00 : f32
    %28 = vector.broadcast %cst_10 : f32 to vector<16x128xf32>
    %29 = arith.subf %28, %27 : vector<16x128xf32>
    %30 = math.exp %29 : vector<16x128xf32>
    %cst_11 = arith.constant 0.000000e+00 : f32
    %31 = vector.broadcast %cst_11 : f32 to vector<16x128xf32>
    %32 = arith.cmpf oge, %26, %31 : vector<16x128xf32>
    %cst_12 = arith.constant 1.000000e+00 : f32
    %33 = vector.broadcast %cst_12 : f32 to vector<16x128xf32>
    %34 = arith.select %32, %33, %30 : vector<16x128xi1>, vector<16x128xf32>
    %cst_13 = arith.constant 1.000000e+00 : f32
    %35 = vector.broadcast %cst_13 : f32 to vector<16x128xf32>
    %36 = arith.addf %35, %30 : vector<16x128xf32>
    %37 = arith.divf %34, %36 : vector<16x128xf32>
    %38 = arith.mulf %37, %37 : vector<16x128xf32>
    %39 = arith.mulf %38, %19 : vector<16x128xf32>
    %c0_14 = arith.constant 0 : index
    %c0_15 = arith.constant 0 : index
    %40 = vector.load %arg4[%c0_14, %c0_15] : memref<1x128xf32, #tpu.memory_space<vmem>>, vector<1x128xf32>
    %cst_16 = arith.constant dense<0.000000e+00> : vector<128xf32>
    %41 = vector.multi_reduction <add>, %39, %cst_16 [0] : vector<16x128xf32> to vector<128xf32>
    %42 = vector.shape_cast %41 : vector<128xf32> to vector<1x128xf32>
    %43 = arith.addf %40, %42 : vector<1x128xf32>
    %c0_17 = arith.constant 0 : index
    %c0_18 = arith.constant 0 : index
    %44 = vector.load %arg4[%c0_17, %c0_18] : memref<1x128xf32, #tpu.memory_space<vmem>>, vector<1x128xf32>
    tpu.vector_store %arg4[%c0_17, %c0_18], %43 {strides = array<i32>} : memref<1x128xf32, #tpu.memory_space<vmem>>, vector<1x128xf32>,
    return
  }
  func.func @transform_0(%arg0: i32, %arg1: i32) -> (i32, i32) {
    %c1_i32 = arith.constant 1 : i32
    %0 = arith.muli %arg0, %c1_i32 : i32
    %1 = arith.addi %0, %arg1 : i32
    %c0_i32 = arith.constant 0 : i32
    %c0_i32_0 = arith.constant 0 : i32
    return %1, %c0_i32 : i32, i32
  }
  func.func @transform_1(%arg0: i32, %arg1: i32) -> (i32, i32) {
    %c1_i32 = arith.constant 1 : i32
    %0 = arith.muli %arg0, %c1_i32 : i32
    %1 = arith.addi %0, %arg1 : i32
    %c0_i32 = arith.constant 0 : i32
    %c0_i32_0 = arith.constant 0 : i32
    return %1, %c0_i32 : i32, i32
  }
  func.func @transform_2(%arg0: i32, %arg1: i32) -> (i32, i32) {
    %c0_i32 = arith.constant 0 : i32
    %c0_i32_0 = arith.constant 0 : i32
    return %c0_i32, %arg0 : i32, i32
  }
}

</mosaic_0001>

<bundles_post_ra>
// kernel: tpu_custom_call.1
= control target key start
LH: loop header
LB: loop body
LE: loop exit
PB: predicated region body
PF: predicated region fallthrough
CT: control target
= control target key end

     0   :  { %7 = vsyncpa [#allocation3], 0  ;;  %s294_s0 = inlined_call_operand.hbm [shape: f32[16,128], index: 0, kind: input, shape index: {}]   ;;  %s295_s1 = inlined_call_operand.hbm [shape: f32[16,128], index: 1, kind: input, shape index: {}]   ;;  %s296_s2 = inlined_call_operand.hbm [shape: f32[1,128], index: 2, kind: output, shape index: {}]  }
   0x1   :  { %8 = vsyncpa [#allocation6], 0 }
   0x2   :  { %9 = vsyncpa [#allocation4], 0  ;;  %s237_s9 = smov [#allocation2]   ;;  %s165_s13 = scalar_lea.hbm %s294_s0, 256 }
   0x3   :  { %s19_s10 = sshll.u32 %s237_s9, 4  ;;  %p166_p0 = scmp.ne.s32.totalorder %s294_s0, %s165_s13  ;;  %s20_s10 = int_to_ptr.vmem [resolvable:$true] %s19_s10 }
   0x4   :  { %p169_p1 = scmp.lt.u32.totalorder %s165_s13, %s294_s0 }
   0x6   :  { %p171_p2 = pnand %p169_p1, %p166_p0 }
   0x8   :  { %174 = shalt.err (!%p171_p2)
}
   0x9   :  { %s175_s18 = scalar_lea.vmem %s20_s10, 256  ;;  %p180_p4 = scmp.lt.s32.totalorder %s20_s10, %s20_s10 }
   0xa   :  { %p176_p3 = scmp.ne.s32.totalorder %s20_s10, %s175_s18  ;;  %p181_p5 = scmp.lt.s32.totalorder %s175_s18, %s175_s18 }
   0xc   :  { %p182_p6 = por %p181_p5, %p180_p4 }
   0xe   :  { %p183_p7 = pnand %p182_p6, %p176_p3 }
  0x10   :  { %186 = shalt.err (!%p183_p7)
}
  0x11   :  { %s238_s19 = smov 128   ;;  %s239_s20 = smov 8  }
  0x12   :  { %25 = dma.hbm_to_vmem [thread:$0]  %s294_s0, 256, %s20_s10, [#allocation3], %s238_s19, %s238_s19, %s239_s20  }
  0x13   :  { %s240_s23 = smov [#allocation5]   ;;  %s187_s27 = scalar_lea.hbm %s295_s1, 256 }
  0x14   :  { %s35_s24 = sshll.u32 %s240_s23, 4  ;;  %p188_p8 = scmp.ne.s32.totalorder %s295_s1, %s187_s27  ;;  %s36_s24 = int_to_ptr.vmem [resolvable:$true] %s35_s24 }
  0x15   :  { %p191_p9 = scmp.lt.u32.totalorder %s187_s27, %s295_s1 }
  0x17   :  { %p193_p10 = pnand %p191_p9, %p188_p8 }
  0x19   :  { %196 = shalt.err (!%p193_p10)
}
  0x1a   :  { %s197_s4 = scalar_lea.vmem %s36_s24, 256  ;;  %p202_p12 = scmp.lt.s32.totalorder %s36_s24, %s36_s24 }
  0x1b   :  { %p198_p11 = scmp.ne.s32.totalorder %s36_s24, %s197_s4  ;;  %p203_p13 = scmp.lt.s32.totalorder %s197_s4, %s197_s4 }
  0x1d   :  { %p204_p0 = por %p203_p13, %p202_p12 }
  0x1f   :  { %p205_p1 = pnand %p204_p0, %p198_p11 }
  0x21   :  { %208 = shalt.err (!%p205_p1)
}
  0x22   :  { %41 = dma.hbm_to_vmem [thread:$0]  %s295_s1, 256, %s36_s24, [#allocation6], %s238_s19, %s238_s19, %s239_s20  }
  0x23   :  { %231 = dma.done.wait [#allocation3], 256  }
  0x24   :  { %232 = vsyncadd [#allocation3], 4294967040 }
  0x25   :  { %233 = dma.done.wait [#allocation6], 256  }
  0x26   :  { %234 = vsyncadd [#allocation6], 4294967040  ;;  %v241_v0 = vmov 0.0   ;;  %v57_v1 = vld [vmem:[#allocation2] sm:$0xff]  ;;  %v58_v2 = vld [vmem:[#allocation2 + $0x8] sm:$0xff]  ;;  %s242_s1 = smov [#allocation7]  }
  0x27   :  { %56 = vst [vmem:[#allocation7] sm:$0x1] %v241_v0  ;;  %v59_v3 = vld [vmem:[#allocation5] sm:$0xff]  ;;  %v60_v4 = vld [vmem:[#allocation5 + $0x8] sm:$0xff]  ;;  %v61_v5 = vand.u32 2147483647, %v57_v1 }
  0x28   :  { %v62_v6 = vand.u32 2147483647, %v58_v2  ;;  %v73_v7 = vsub.f32 0.0, %v57_v1  ;;  %v74_v8 = vsub.f32 0.0, %v58_v2  ;;  %v87_v9 = vmul.f32 2.0, %v59_v3  ;;  %s131_s6 = sshll.u32 %s242_s1, 4  ;;  %s132_s6 = int_to_ptr.vmem [resolvable:$true] %s131_s6 }
  0x29   :  { %v88_v10 = vmul.f32 2.0, %v60_v4  ;;  %v63_v11 = vsub.f32 0.0, %v61_v5  ;;  %v69_v32 = vmul.f32 %v59_v3, %v57_v1  ;;  %v70_v34 = vmul.f32 %v60_v4, %v58_v2  ;;  %s209_s7 = scalar_lea.vmem %s132_s6, 16  ;;  %s213_s8 = scalar_lea.vmem %s132_s6, 32 }
  0x2a   :  { %v64_v12 = vsub.f32 0.0, %v62_v6  ;;  %v141_v13 = vadd.f32 -1.0, %v87_v9  ;;  %v75_v36 = vmax.f32 %v73_v7, 0.0  ;;  %v76_v39 = vmax.f32 %v74_v8, 0.0  ;;  %p210_p2 = scmp.ne.s32.totalorder %s132_s6, %s209_s7  ;;  %p214_p3 = scmp.lt.s32.totalorder %s132_s6, %s132_s6 }
  0x2b   :  { %v142_v14 = vadd.f32 -1.0, %v88_v10  ;;  %v65_v15 = vmul.f32 1.442695, %v63_v11  ;;  %v71_v35 = vsub.f32 %v57_v1, %v69_v32  ;;  %v72_v38 = vsub.f32 %v58_v2, %v70_v34  ;;  %p215_p4 = scmp.lt.s32.totalorder %s213_s8, %s209_s7 }
  0x2c   :  { %v67_v16 = vmul.f32 1.442695, %v64_v12  ;;  %v91_v17 = vmul.f32 %v141_v13, %v73_v7 }
  0x2d   :  { %v92_v18 = vmul.f32 %v142_v14, %v74_v8  ;;  %149 = vpow2.f32 %v65_v15  ;;  %v77_v41 = vadd.f32 %v75_v36, %v71_v35  ;;  %v78_v43 = vadd.f32 %v76_v39, %v72_v38  ;;  %p216_p5 = por %p215_p4, %p214_p3 }
  0x2e   :  { %151 = vpow2.f32 %v67_v16  ;;  %v93_v19 = vand.u32 2147483647, %v91_v17  ;;  %vm101_vm0 = vcmp.ge.f32.partialorder %v91_v17, 0.0  ;;  %v115_v63 = vld [vmem:[#allocation7] sm:$0x1] }
  0x2f   :  { %v94_v20 = vand.u32 2147483647, %v92_v18  ;;  %vm102_vm1 = vcmp.ge.f32.partialorder %v92_v18, 0.0  ;;  %p217_p6 = pnand %p216_p5, %p210_p2 }
  0x30   :  { %v95_v21 = vsub.f32 0.0, %v93_v19 }
  0x31   :  { %v96_v22 = vsub.f32 0.0, %v94_v20 }
  0x32   :  { %v97_v23 = vmul.f32 1.442695, %v95_v21 }
  0x33   :  { %v99_v24 = vmul.f32 1.442695, %v96_v22 }
  0x34   :  { %153 = vpow2.f32 %v97_v23 }
  0x35   :  { %155 = vpow2.f32 %v99_v24 }
  0x37   :  { %v150_v25 = vpop.eup %149 }
  0x38   :  { %v152_v26 = vpop.eup %151  ;;  %v79_v27 = vadd.f32 1.0, %v150_v25 }
  0x39   :  { %v80_v28 = vadd.f32 1.0, %v152_v26 }
  0x3a   :  { %157 = vlog2.f32 %v79_v27 }
  0x3b   :  { %159 = vlog2.f32 %v80_v28 }
  0x3e   :  { %v154_v29 = vpop.eup %153 }
  0x3f   :  { %v156_v30 = vpop.eup %155  ;;  %v105_v31 = vadd.f32 1.0, %v154_v29  ;;  %v103_v45 = vsel %vm101_vm0, 1.0, %v154_v29 }
  0x40   :  { %v106_v33 = vadd.f32 1.0, %v156_v30  ;;  %v104_v46 = vsel %vm102_vm1, 1.0, %v156_v30 }
  0x41   :  { %161 = vrcp.f32 %v105_v31 }
  0x42   :  { %163 = vrcp.f32 %v106_v33 }
  0x44   :  { %v158_v37 = vpop.eup %157 }
  0x45   :  { %v160_v40 = vpop.eup %159  ;;  %v82_v42 = vmul.f32 0.6931472, %v158_v37 }
  0x46   :  { %v84_v44 = vmul.f32 0.6931472, %v160_v40 }
  0x47   :  { %v85_v49 = vadd.f32 %v82_v42, %v77_v41 }
  0x48   :  { %v86_v51 = vadd.f32 %v84_v44, %v78_v43 }
  0x4b   :  { %v162_v47 = vpop.eup %161 }
  0x4c   :  { %v164_v48 = vpop.eup %163  ;;  %v108_v50 = vmul.f32 %v162_v47, %v103_v45 }
  0x4d   :  { %v110_v52 = vmul.f32 %v164_v48, %v104_v46 }
  0x4e   :  { %v111_v53 = vmul.f32 %v108_v50, %v108_v50 }
  0x4f   :  { %v112_v54 = vmul.f32 %v110_v52, %v110_v52 }
  0x50   :  { %v113_v55 = vmul.f32 %v111_v53, %v85_v49 }
  0x51   :  { %v114_v56 = vmul.f32 %v112_v54, %v86_v51 }
  0x53   :  { %v116_v57 = vadd.f32 %v114_v56, %v113_v55 }
  0x55   :  { %v117_v58 = vrot.slane %v116_v57, 4 }
  0x57   :  { %v118_v59 = vadd.f32 %v117_v58, %v116_v57 }
  0x59   :  { %v119_v60 = vrot.slane %v118_v59, 2 }
  0x5b   :  { %v120_v61 = vadd.f32 %v119_v60, %v118_v59 }
  0x5d   :  { %v121_v62 = vrot.slane %v120_v61, 1 }
  0x5f   :  { %v122_v0 = vadd.f32 %v121_v62, %v120_v61 }
  0x61   :  { %v123_v1 = vadd.f32 %v122_v0, %v115_v63 }
  0x63   :  { %124 = vst [vmem:[#allocation7] sm:$0x1] %v123_v1 }
  0x64   :  { %220 = shalt.err (!%p217_p6)
}
  0x65   :  { %s221_s11 = scalar_lea.hbm %s296_s2, 16 }
  0x66   :  { %p222_p7 = scmp.ne.s32.totalorder %s296_s2, %s221_s11  ;;  %p225_p8 = scmp.lt.u32.totalorder %s221_s11, %s296_s2 }
  0x68   :  { %p227_p9 = pnand %p225_p8, %p222_p7 }
  0x6a   :  { %230 = shalt.err (!%p227_p9)
}
  0x6b   :  { %134 = dma.vmem_to_hbm [thread:$0]  %s132_s6, 16, %s296_s2, [#allocation4]  }
  0x6c   :  { %235 = dma.done.wait [#allocation4], 16  }
  0x6d   :  { %236 = vsyncadd [#allocation4], 4294967280 }
  0x6e   :  { %138 = vsyncpa [#allocation3], 1 }
  0x6f   :  { %139 = vsyncpa [#allocation6], 1 }
  0x70   :  { %140 = vsyncpa [#allocation4], 1 }

</bundles_post_ra>
